<compile_context>
chip_gen: v7x
topology: tpu7x:2x2x1
jax: 0.10.0
libtpu: 0.0.40
codegen_flags: <defaults>
</compile_context>

<pallas_src>
import functools
import math

import jax
import jax.numpy as jnp
from jax import lax
from jax.experimental import pallas as pl
from jax.experimental.pallas import tpu as pltpu


def _choose_tile(dim, preferred, align):
    """Largest tile <= preferred that divides `dim` and is a multiple of `align`.

    Falls back to the full dim (a full-extent block is always a legal
    block_shape regardless of the (8, 128) alignment rule).
    """
    if dim <= preferred:
        return dim
    t = (preferred // align) * align
    while t >= align:
        if dim % t == 0:
            return t
        t -= align
    return dim


def _lora_linear_kernel(x_ref, w_ref, b_ref, a_ref, bt_ref, o_ref,
                        acc_ref, xa_ref, *, scaling):
    # x_ref : (tm, tk)        activations tile
    # w_ref : (tn, tk)        frozen weight tile, (out, in) layout (no HBM transpose)
    # b_ref : (1, tn)         bias tile
    # a_ref : (rank_pad, tk)  lora_A tile, zero-padded along rank
    # bt_ref: (tn, rank_pad)  lora_B tile, zero-padded along rank
    # o_ref : (tm, tn)
    # acc_ref: (tm, tn)  f32  accumulator (bias folded in at init)
    # xa_ref : (tm, rank_pad) f32 accumulator for x @ A.T over k
    k = pl.program_id(2)
    nk = pl.num_programs(2)

    @pl.when(k == 0)
    def _():
        acc_ref[...] = jnp.broadcast_to(
            b_ref[...].astype(jnp.float32), acc_ref.shape)
        xa_ref[...] = jnp.zeros_like(xa_ref)

    x = x_ref[...]

    # Frozen path: (tm, tk) x (tn, tk) contracted over tk -> (tm, tn)  [== x @ W.T]
    acc_ref[...] += lax.dot_general(
        x, w_ref[...], (((1,), (1,)), ((), ())),
        preferred_element_type=jnp.float32)

    # LoRA stage 1: (tm, tk) x (rank_pad, tk) contracted over tk -> (tm, rank_pad)
    xa_ref[...] += lax.dot_general(
        x, a_ref[...], (((1,), (1,)), ((), ())),
        preferred_element_type=jnp.float32)

    @pl.when(k == nk - 1)
    def _():
        # LoRA stage 2 only after the k-reduction is complete. Scale the small
        # (tm, rank_pad) intermediate (cheaper than scaling the (tm, tn) tile).
        lora = lax.dot_general(
            xa_ref[...] * scaling, bt_ref[...], (((1,), (1,)), ((), ())),
            preferred_element_type=jnp.float32)
        o_ref[...] = (acc_ref[...] + lora).astype(o_ref.dtype)


def lora_linear_forward(x, w, b, lora_a, lora_b, *, lora_alpha,
                        tm_pref=256, tn_pref=256, tk_pref=512):
    """x: (batch, seq, in). w: (out, in). b: (out,). lora_a: (rank, in). lora_b: (out, rank).

    Tile preferences are generation-agnostic defaults (multiples of 128 for the
    lane dims); re-sweep tk/tn upward on v6e (bigger MXU, 128 MiB VMEM) and keep
    them modest on v7x (64 MiB VMEM).
    """
    batch, seq, in_features = x.shape
    out_features, _ = w.shape
    rank = lora_a.shape[0]
    assert rank > 0, "rank == 0 path is just the frozen linear"
    scaling = float(lora_alpha) / float(rank)

    m = batch * seq
    x2d = x.reshape(m, in_features)
    b2d = b.reshape(1, out_features)

    # Zero-pad the rank dimension up to a lane-dense multiple of 128. Padding is
    # zeros, so the padded rows/cols contribute nothing to the result.
    rank_pad = 128 * pl.cdiv(rank, 128)
    if rank_pad != rank:
        lora_a = jnp.pad(lora_a, ((0, rank_pad - rank), (0, 0)))
        lora_b = jnp.pad(lora_b, ((0, 0), (0, rank_pad - rank)))

    tm = _choose_tile(m, tm_pref, 8)
    tn = _choose_tile(out_features, tn_pref, 128)
    tk = _choose_tile(in_features, tk_pref, 128)
    grid = (m // tm, out_features // tn, in_features // tk)  # reduction axis last

    kernel = functools.partial(_lora_linear_kernel, scaling=scaling)

    flops = (2 * m * in_features * out_features
             + 2 * m * in_features * rank_pad
             + 2 * m * rank_pad * out_features)
    bytes_accessed = (x2d.size * x2d.dtype.itemsize
                      + w.size * w.dtype.itemsize
                      + b2d.size * b2d.dtype.itemsize
                      + lora_a.size * lora_a.dtype.itemsize
                      + lora_b.size * lora_b.dtype.itemsize
                      + m * out_features * x.dtype.itemsize)

    out2d = pl.pallas_call(
        kernel,
        out_shape=jax.ShapeDtypeStruct((m, out_features), x.dtype),
        grid=grid,
        in_specs=[
            pl.BlockSpec((tm, tk), lambda i, j, k: (i, k)),        # x
            pl.BlockSpec((tn, tk), lambda i, j, k: (j, k)),        # W (out, in)
            pl.BlockSpec((1, tn), lambda i, j, k: (0, j)),         # bias
            pl.BlockSpec((rank_pad, tk), lambda i, j, k: (0, k)),  # lora_A (padded)
            pl.BlockSpec((tn, rank_pad), lambda i, j, k: (j, 0)),  # lora_B (padded)
        ],
        out_specs=pl.BlockSpec((tm, tn), lambda i, j, k: (i, j)),
        scratch_shapes=[
            pltpu.VMEM((tm, tn), jnp.float32),        # main accumulator
            pltpu.VMEM((tm, rank_pad), jnp.float32),  # x @ A.T accumulator
        ],
        compiler_params=pltpu.CompilerParams(
            dimension_semantics=("parallel", "parallel", "arbitrary"),
            vmem_limit_bytes=64 * 1024 * 1024,
        ),
        cost_estimate=pl.CostEstimate(
            flops=flops, transcendentals=0, bytes_accessed=bytes_accessed),
    )(x2d, w, b2d, lora_a, lora_b)

    return out2d.reshape(batch, seq, out_features)


def _reference(x, w, b, lora_a, lora_b, lora_alpha):
    scaling = float(lora_alpha) / float(lora_a.shape[0])
    pretrained = jnp.einsum("bsi,oi->bso", x, w) + b
    lora = jnp.einsum("bsi,ri->bsr", x, lora_a)
    lora = jnp.einsum("bsr,or->bso", lora, lora_b) * scaling
    return pretrained + lora


if __name__ == "__main__":
    batch, seq = 2, 8
    in_features, out_features, rank = 32, 32, 4
    lora_alpha = 8

    key = jax.random.PRNGKey(0)
    kx, kw, kb, ka, kB = jax.random.split(key, 5)

    # x input
    x = jax.random.normal(kx, (batch, seq, in_features), dtype=jnp.float32)

    # linear.weight: kaiming_normal_(a=sqrt(5)) -> std = sqrt(2/(1+5))/sqrt(fan_in)
    w_std = math.sqrt(2.0 / (1.0 + 5.0)) / math.sqrt(in_features)
    w = jax.random.normal(kw, (out_features, in_features), dtype=jnp.float32) * w_std

    # linear.bias: nn.Linear default uniform(-1/sqrt(fan_in), 1/sqrt(fan_in))
    b_bound = 1.0 / math.sqrt(in_features)
    b = jax.random.uniform(kb, (out_features,), dtype=jnp.float32,
                           minval=-b_bound, maxval=b_bound)

    # lora_A: kaiming_uniform_(a=sqrt(5)) -> bound = sqrt(1/fan_in)
    a_bound = 1.0 / math.sqrt(in_features)
    lora_a = jax.random.uniform(ka, (rank, in_features), dtype=jnp.float32,
                                minval=-a_bound, maxval=a_bound)

    # lora_B is zero-initialized in the module; use small deterministic nonzero
    # values here so the LoRA branch of the kernel is actually exercised.
    lora_b = jax.random.normal(kB, (out_features, rank), dtype=jnp.float32) * 0.02

    out = lora_linear_forward(x, w, b, lora_a, lora_b, lora_alpha=lora_alpha)
    out = jax.block_until_ready(out)

    ref = _reference(x, w, b, lora_a, lora_b, lora_alpha)
    assert out.shape == (batch, seq, out_features)
    assert jnp.allclose(out, ref, atol=1e-5, rtol=1e-5), "mismatch vs reference"

    print("KERNEL_OK")
</pallas_src>

<mosaic_0001>
module attributes {stable_mosaic.version = 11 : i64} {
  func.func @_lora_linear_kernel(%arg0: i32, %arg1: i32, %arg2: i32, %arg3: memref<16x32xf32, #tpu.memory_space<vmem>>, %arg4: memref<32x32xf32, #tpu.memory_space<vmem>>, %arg5: memref<1x32xf32, #tpu.memory_space<vmem>>, %arg6: memref<128x32xf32, #tpu.memory_space<vmem>>, %arg7: memref<32x128xf32, #tpu.memory_space<vmem>>, %arg8: memref<16x32xf32, #tpu.memory_space<vmem>>, %arg9: memref<16x32xf32, #tpu.memory_space<vmem>>, %arg10: memref<16x128xf32, #tpu.memory_space<vmem>>) attributes {dimension_semantics = [#tpu.dimension_semantics<parallel>, #tpu.dimension_semantics<parallel>, #tpu.dimension_semantics<arbitrary>], iteration_bounds = array<i64: 1, 1, 1>, scalar_prefetch = 0 : i64, scratch_operands = 2 : i64, tpu.core_type = #tpu.core_type<tc>, window_params = [{transform_indices = @transform_0, window_bounds = array<i64: 16, 32>}, {transform_indices = @transform_1, window_bounds = array<i64: 32, 32>}, {transform_indices = @transform_2, window_bounds = array<i64: 1, 32>}, {transform_indices = @transform_3, window_bounds = array<i64: 128, 32>}, {transform_indices = @transform_4, window_bounds = array<i64: 32, 128>}, {transform_indices = @transform_5, window_bounds = array<i64: 16, 32>}]} {
    %c0_i32 = arith.constant 0 : i32
    %0 = arith.cmpi eq, %arg2, %c0_i32 : i32
    %1 = arith.extui %0 : i1 to i32
    %c0_i32_0 = arith.constant 0 : i32
    %2 = arith.cmpi ne, %1, %c0_i32_0 : i32
    scf.if %2 {
      %c0_17 = arith.constant 0 : index
      %c0_18 = arith.constant 0 : index
      %17 = vector.load %arg5[%c0_17, %c0_18] : memref<1x32xf32, #tpu.memory_space<vmem>>, vector<1x32xf32>
      %18 = vector.shape_cast %17 : vector<1x32xf32> to vector<1x32xf32>
      %19 = vector.broadcast %18 : vector<1x32xf32> to vector<16x32xf32>
      %c0_19 = arith.constant 0 : index
      %c0_20 = arith.constant 0 : index
      %20 = vector.load %arg9[%c0_19, %c0_20] : memref<16x32xf32, #tpu.memory_space<vmem>>, vector<16x32xf32>
      tpu.vector_store %arg9[%c0_19, %c0_20], %19 {strides = array<i32>} : memref<16x32xf32, #tpu.memory_space<vmem>>, vector<16x32xf32>,
      %cst_21 = arith.constant 0.000000e+00 : f32
      %21 = vector.broadcast %cst_21 : f32 to vector<16x128xf32>
      %c0_22 = arith.constant 0 : index
      %c0_23 = arith.constant 0 : index
      %22 = vector.load %arg10[%c0_22, %c0_23] : memref<16x128xf32, #tpu.memory_space<vmem>>, vector<16x128xf32>
      tpu.vector_store %arg10[%c0_22, %c0_23], %21 {strides = array<i32>} : memref<16x128xf32, #tpu.memory_space<vmem>>, vector<16x128xf32>,
    } else {
    }
    %c0 = arith.constant 0 : index
    %c0_1 = arith.constant 0 : index
    %3 = vector.load %arg3[%c0, %c0_1] : memref<16x32xf32, #tpu.memory_space<vmem>>, vector<16x32xf32>
    %c0_2 = arith.constant 0 : index
    %c0_3 = arith.constant 0 : index
    %4 = vector.load %arg9[%c0_2, %c0_3] : memref<16x32xf32, #tpu.memory_space<vmem>>, vector<16x32xf32>
    %c0_4 = arith.constant 0 : index
    %c0_5 = arith.constant 0 : index
    %5 = vector.load %arg4[%c0_4, %c0_5] : memref<32x32xf32, #tpu.memory_space<vmem>>, vector<32x32xf32>
    %cst = arith.constant dense<0.000000e+00> : vector<16x32xf32>
    %6 = tpu.matmul %3, %5, %cst {dimension_numbers = #tpu.dot_dimension_numbers<[1], [1], [0], [0], [0, 0, 1, 0], [], []>} : vector<16x32xf32>, vector<32x32xf32>, vector<16x32xf32> -> vector<16x32xf32>
    %7 = arith.addf %4, %6 : vector<16x32xf32>
    %c0_6 = arith.constant 0 : index
    %c0_7 = arith.constant 0 : index
    %8 = vector.load %arg9[%c0_6, %c0_7] : memref<16x32xf32, #tpu.memory_space<vmem>>, vector<16x32xf32>
    tpu.vector_store %arg9[%c0_6, %c0_7], %7 {strides = array<i32>} : memref<16x32xf32, #tpu.memory_space<vmem>>, vector<16x32xf32>,
    %c0_8 = arith.constant 0 : index
    %c0_9 = arith.constant 0 : index
    %9 = vector.load %arg10[%c0_8, %c0_9] : memref<16x128xf32, #tpu.memory_space<vmem>>, vector<16x128xf32>
    %c0_10 = arith.constant 0 : index
    %c0_11 = arith.constant 0 : index
    %10 = vector.load %arg6[%c0_10, %c0_11] : memref<128x32xf32, #tpu.memory_space<vmem>>, vector<128x32xf32>
    %cst_12 = arith.constant dense<0.000000e+00> : vector<16x128xf32>
    %11 = tpu.matmul %3, %10, %cst_12 {dimension_numbers = #tpu.dot_dimension_numbers<[1], [1], [0], [0], [0, 0, 1, 0], [], []>} : vector<16x32xf32>, vector<128x32xf32>, vector<16x128xf32> -> vector<16x128xf32>
    %12 = arith.addf %9, %11 : vector<16x128xf32>
    %c0_13 = arith.constant 0 : index
    %c0_14 = arith.constant 0 : index
    %13 = vector.load %arg10[%c0_13, %c0_14] : memref<16x128xf32, #tpu.memory_space<vmem>>, vector<16x128xf32>
    tpu.vector_store %arg10[%c0_13, %c0_14], %12 {strides = array<i32>} : memref<16x128xf32, #tpu.memory_space<vmem>>, vector<16x128xf32>,
    %c0_i32_15 = arith.constant 0 : i32
    %14 = arith.cmpi eq, %arg2, %c0_i32_15 : i32
    %15 = arith.extui %14 : i1 to i32
    %c0_i32_16 = arith.constant 0 : i32
    %16 = arith.cmpi ne, %15, %c0_i32_16 : i32
    scf.if %16 {
      %c0_17 = arith.constant 0 : index
      %c0_18 = arith.constant 0 : index
      %17 = vector.load %arg10[%c0_17, %c0_18] : memref<16x128xf32, #tpu.memory_space<vmem>>, vector<16x128xf32>
      %cst_19 = arith.constant 2.000000e+00 : f32
      %18 = vector.broadcast %cst_19 : f32 to vector<16x128xf32>
      %19 = arith.mulf %17, %18 : vector<16x128xf32>
      %c0_20 = arith.constant 0 : index
      %c0_21 = arith.constant 0 : index
      %20 = vector.load %arg7[%c0_20, %c0_21] : memref<32x128xf32, #tpu.memory_space<vmem>>, vector<32x128xf32>
      %cst_22 = arith.constant dense<0.000000e+00> : vector<16x32xf32>
      %21 = tpu.matmul %19, %20, %cst_22 {dimension_numbers = #tpu.dot_dimension_numbers<[1], [1], [0], [0], [0, 0, 1, 0], [], []>} : vector<16x128xf32>, vector<32x128xf32>, vector<16x32xf32> -> vector<16x32xf32>
      %c0_23 = arith.constant 0 : index
      %c0_24 = arith.constant 0 : index
      %22 = vector.load %arg9[%c0_23, %c0_24] : memref<16x32xf32, #tpu.memory_space<vmem>>, vector<16x32xf32>
      %23 = arith.addf %22, %21 : vector<16x32xf32>
      %c0_25 = arith.constant 0 : index
      %c0_26 = arith.constant 0 : index
      %24 = vector.load %arg8[%c0_25, %c0_26] : memref<16x32xf32, #tpu.memory_space<vmem>>, vector<16x32xf32>
      tpu.vector_store %arg8[%c0_25, %c0_26], %23 {strides = array<i32>} : memref<16x32xf32, #tpu.memory_space<vmem>>, vector<16x32xf32>,
    } else {
    }
    return
  }
  func.func @transform_0(%arg0: i32, %arg1: i32, %arg2: i32) -> (i32, i32) {
    %c0_i32 = arith.constant 0 : i32
    return %arg0, %arg2 : i32, i32
  }
  func.func @transform_1(%arg0: i32, %arg1: i32, %arg2: i32) -> (i32, i32) {
    %c0_i32 = arith.constant 0 : i32
    return %arg1, %arg2 : i32, i32
  }
  func.func @transform_2(%arg0: i32, %arg1: i32, %arg2: i32) -> (i32, i32) {
    %c0_i32 = arith.constant 0 : i32
    %c0_i32_0 = arith.constant 0 : i32
    return %c0_i32, %arg1 : i32, i32
  }
  func.func @transform_3(%arg0: i32, %arg1: i32, %arg2: i32) -> (i32, i32) {
    %c0_i32 = arith.constant 0 : i32
    %c0_i32_0 = arith.constant 0 : i32
    return %c0_i32, %arg2 : i32, i32
  }
  func.func @transform_4(%arg0: i32, %arg1: i32, %arg2: i32) -> (i32, i32) {
    %c0_i32 = arith.constant 0 : i32
    %c0_i32_0 = arith.constant 0 : i32
    return %arg1, %c0_i32 : i32, i32
  }
  func.func @transform_5(%arg0: i32, %arg1: i32, %arg2: i32) -> (i32, i32) {
    %c0_i32 = arith.constant 0 : i32
    return %arg0, %arg1 : i32, i32
  }
}

</mosaic_0001>

<bundles_post_ra>
// kernel: tpu_custom_call.1
= control target key start
LH: loop header
LB: loop body
LE: loop exit
PB: predicated region body
PF: predicated region fallthrough
CT: control target
= control target key end

     0   :  { %10 = vsyncpa [#allocation5], 0  ;;  %s981_s0 = inlined_call_operand.hbm [shape: f32[16,32], index: 0, kind: input, shape index: {}]   ;;  %s982_s1 = inlined_call_operand.hbm [shape: f32[32,32], index: 1, kind: input, shape index: {}]   ;;  %s983_s2 = inlined_call_operand.hbm [shape: f32[1,32], index: 2, kind: input, shape index: {}]   ;;  %s984_s3 = inlined_call_operand.hbm [shape: f32[128,32], index: 3, kind: input, shape index: {}]   ;;  %s985_s4 = inlined_call_operand.hbm [shape: f32[32,128], index: 4, kind: input, shape index: {}]   ;;  %s986_s5 = inlined_call_operand.hbm [shape: f32[16,32], index: 5, kind: output, shape index: {}]  }
   0x1   :  { %11 = vsyncpa [#allocation8], 0 }
   0x2   :  { %12 = vsyncpa [#allocation11], 0 }
   0x3   :  { %13 = vsyncpa [#allocation6], 0  ;;  %s793_s18 = smov [#allocation7]   ;;  %s794_s20 = smov [#allocation10]  }
   0x4   :  { %s31_s19 = sshll.u32 %s793_s18, 4  ;;  %s53_s21 = sshll.u32 %s794_s20, 4  ;;  %s32_s19 = int_to_ptr.vmem [resolvable:$true] %s31_s19  ;;  %s831_s21 = int_to_ptr.vmem [resolvable:$true] %s53_s21 }
   0x5   :  { %s653_s24 = scalar_lea.hbm %s982_s1, 512 }
   0x6   :  { %p654_p0 = scmp.ne.s32.totalorder %s982_s1, %s653_s24  ;;  %p657_p1 = scmp.lt.u32.totalorder %s653_s24, %s982_s1 }
   0x8   :  { %p659_p2 = pnand %p657_p1, %p654_p0 }
   0xa   :  { %662 = shalt.err (!%p659_p2)
}
   0xb   :  { %s663_s29 = scalar_lea.vmem %s32_s19, 512  ;;  %p668_p4 = scmp.lt.s32.totalorder %s32_s19, %s32_s19 }
   0xc   :  { %p664_p3 = scmp.ne.s32.totalorder %s32_s19, %s663_s29  ;;  %p669_p5 = scmp.lt.s32.totalorder %s663_s29, %s663_s29 }
   0xe   :  { %p670_p6 = por %p669_p5, %p668_p4 }
  0x10   :  { %p671_p7 = pnand %p670_p6, %p664_p3 }
  0x12   :  { %674 = shalt.err (!%p671_p7)
}
  0x13   :  { %s795_s30 = smov 128   ;;  %s796_s6 = smov 8  }
  0x14   :  { %37 = dma.hbm_to_vmem [thread:$0]  %s982_s1, 512, %s32_s19, [#allocation8], %s795_s30, %s795_s30, %s796_s6  }
  0x15   :  { %s675_s11 = scalar_lea.hbm %s984_s3, 2048 }
  0x16   :  { %p676_p8 = scmp.ne.s32.totalorder %s984_s3, %s675_s11  ;;  %p679_p9 = scmp.lt.u32.totalorder %s675_s11, %s984_s3 }
  0x18   :  { %p681_p10 = pnand %p679_p9, %p676_p8 }
  0x1a   :  { %684 = shalt.err (!%p681_p10)
}
  0x1b   :  { %s685_s16 = scalar_lea.vmem %s831_s21, 2048  ;;  %p690_p12 = scmp.lt.s32.totalorder %s831_s21, %s831_s21 }
  0x1c   :  { %p686_p11 = scmp.ne.s32.totalorder %s831_s21, %s685_s16  ;;  %p691_p13 = scmp.lt.s32.totalorder %s685_s16, %s685_s16 }
  0x1e   :  { %p692_p0 = por %p691_p13, %p690_p12 }
  0x20   :  { %p693_p1 = pnand %p692_p0, %p686_p11 }
  0x22   :  { %696 = shalt.err (!%p693_p1)
}
  0x23   :  { %59 = dma.hbm_to_vmem [thread:$0]  %s984_s3, 2048, %s831_s21, [#allocation11], %s795_s30, %s795_s30, %s796_s6  }
  0x24   :  { %s797_s18 = smov [#allocation4]   ;;  %s798_s20 = smov [#allocation9]  }
  0x25   :  { %s19_s19 = sshll.u32 %s797_s18, 4  ;;  %s44_s22 = sshll.u32 %s798_s20, 4  ;;  %s20_s19 = int_to_ptr.vmem [resolvable:$true] %s19_s19  ;;  %s45_s22 = int_to_ptr.vmem [resolvable:$true] %s44_s22 }
  0x26   :  { %s697_s25 = scalar_lea.hbm %s981_s0, 256 }
  0x27   :  { %p698_p2 = scmp.ne.s32.totalorder %s981_s0, %s697_s25  ;;  %p701_p3 = scmp.lt.u32.totalorder %s697_s25, %s981_s0 }
  0x29   :  { %p703_p4 = pnand %p701_p3, %p698_p2 }
  0x2b   :  { %706 = shalt.err (!%p703_p4)
}
  0x2c   :  { %s707_s3 = scalar_lea.vmem %s20_s19, 256  ;;  %p712_p6 = scmp.lt.s32.totalorder %s20_s19, %s20_s19 }
  0x2d   :  { %p708_p5 = scmp.ne.s32.totalorder %s20_s19, %s707_s3  ;;  %p713_p7 = scmp.lt.s32.totalorder %s707_s3, %s707_s3 }
  0x2f   :  { %p714_p8 = por %p713_p7, %p712_p6 }
  0x31   :  { %p715_p9 = pnand %p714_p8, %p708_p5 }
  0x33   :  { %718 = shalt.err (!%p715_p9)
}
  0x34   :  { %25 = dma.hbm_to_vmem [thread:$0]  %s981_s0, 256, %s20_s19, [#allocation5], %s795_s30, %s795_s30, %s796_s6  }
  0x35   :  { %s719_s10 = scalar_lea.hbm %s983_s2, 16 }
  0x36   :  { %p720_p10 = scmp.ne.s32.totalorder %s983_s2, %s719_s10  ;;  %p723_p11 = scmp.lt.u32.totalorder %s719_s10, %s983_s2 }
  0x38   :  { %p725_p12 = pnand %p723_p11, %p720_p10 }
  0x3a   :  { %728 = shalt.err (!%p725_p12)
}
  0x3b   :  { %s729_s15 = scalar_lea.vmem %s45_s22, 16  ;;  %s733_s16 = scalar_lea.vmem %s45_s22, 32 }
  0x3c   :  { %p730_p13 = scmp.ne.s32.totalorder %s45_s22, %s729_s15  ;;  %p734_p0 = scmp.lt.s32.totalorder %s45_s22, %s45_s22 }
  0x3d   :  { %p735_p1 = scmp.lt.s32.totalorder %s733_s16, %s729_s15 }
  0x3f   :  { %p736_p2 = por %p735_p1, %p734_p0 }
  0x41   :  { %p737_p3 = pnand %p736_p2, %p730_p13 }
  0x43   :  { %740 = shalt.err (!%p737_p3)
}
  0x44   :  { %47 = dma.hbm_to_vmem [thread:$0]  %s983_s2, 16, %s45_s22, [#allocation8]  }
  0x45   :  { %s799_s17 = smov [#allocation12]   ;;  %s741_s23 = scalar_lea.hbm %s985_s4, 512 }
  0x46   :  { %s65_s18 = sshll.u32 %s799_s17, 4  ;;  %p742_p4 = scmp.ne.s32.totalorder %s985_s4, %s741_s23  ;;  %s66_s18 = int_to_ptr.vmem [resolvable:$true] %s65_s18 }
  0x47   :  { %p745_p5 = scmp.lt.u32.totalorder %s741_s23, %s985_s4 }
  0x49   :  { %p747_p6 = pnand %p745_p5, %p742_p4 }
  0x4b   :  { %750 = shalt.err (!%p747_p6)
}
  0x4c   :  { %s751_s28 = scalar_lea.vmem %s66_s18, 512  ;;  %p756_p8 = scmp.lt.s32.totalorder %s66_s18, %s66_s18 }
  0x4d   :  { %p752_p7 = scmp.ne.s32.totalorder %s66_s18, %s751_s28  ;;  %p757_p9 = scmp.lt.s32.totalorder %s751_s28, %s751_s28 }
  0x4f   :  { %p758_p10 = por %p757_p9, %p756_p8 }
  0x51   :  { %p759_p11 = pnand %p758_p10, %p752_p7 }
  0x53   :  { %762 = shalt.err (!%p759_p11)
}
  0x54   :  { %71 = dma.hbm_to_vmem [thread:$0]  %s985_s4, 512, %s66_s18, [#allocation11], %s795_s30, %s795_s30, %s796_s6  }
  0x55   :  { %785 = dma.done.wait [#allocation5], 256  }
  0x56   :  { %786 = vsyncadd [#allocation5], 4294967040 }
  0x57   :  { %787 = dma.done.wait [#allocation8], 528  }
  0x58   :  { %788 = vsyncadd [#allocation8], 4294966768 }
  0x59   :  { %789 = dma.done.wait [#allocation11], 2560  }
  0x5a   :  { %790 = vsyncadd [#allocation11], 4294964736  ;;  %vm98_vm0 = vcmask 261120   ;;  %v211_v1 = vld [vmem:[#allocation10] sm:$0xff]  ;;  %v212_v2 = vld [vmem:[#allocation10 + $0x8] sm:$0xff]  ;;  %s800_s4 = smov [#allocation13]  }
  0x5b   :  { %vm912_vm1 = vmpackc.low %vm98_vm0, %vm98_vm0  ;;  %v213_v3 = vld [vmem:[#allocation10 + $0x10] sm:$0xff]  ;;  %v589_v4 = vpack.c.bf16 %v212_v2, %v211_v1  ;;  %v214_v5 = vld [vmem:[#allocation10 + $0x18] sm:$0xff]  ;;  %s451_s29 = sshll.u32 %s800_s4, 4  ;;  %s452_s29 = int_to_ptr.vmem [resolvable:$true] %s451_s29 }
  0x5c   :  { %v595_v6 = vpack.c.bf16 %v214_v5, %v213_v3  ;;  %v215_v7 = vld [vmem:[#allocation10 + $0x20] sm:$0xff]  ;;  %v216_v8 = vld [vmem:[#allocation10 + $0x28] sm:$0xff]  ;;  %v110_v14 = vld [vmem:[#allocation7 + $0x18] sm:$0xff]  ;;  %s763_s3 = scalar_lea.vmem %s452_s29, 256  ;;  %p768_p13 = scmp.lt.s32.totalorder %s452_s29, %s452_s29 }
  0x5d   :  { %591 = vmatprep.subr.msk.bf16.mxu1 %vm912_vm1, %v589_v4  ;;  %v103_v9 = vld [vmem:[#allocation4] sm:$0xff]  ;;  %v107_v10 = vld [vmem:[#allocation7] sm:$0xff]  ;;  %v108_v11 = vld [vmem:[#allocation7 + $0x8] sm:$0xff]  ;;  %v601_v16 = vpack.c.bf16 %v216_v8, %v215_v7  ;;  %p764_p12 = scmp.ne.s32.totalorder %s452_s29, %s763_s3  ;;  %p769_p0 = scmp.lt.s32.totalorder %s763_s3, %s763_s3 }
  0x5e   :  { %594 = vmatpush3.bf16.xpose.msk.msra.mxu1 %vm912_vm1, %v589_v4  ;;  %563 = vmatprep.mubr.msk.f32.mxu1 %vm98_vm0, %v103_v9  ;;  %v109_v12 = vld [vmem:[#allocation7 + $0x10] sm:$0xff]  ;;  %v577_v13 = vpack.c.bf16 %v108_v11, %v107_v10  ;;  %v361_v17 = vld [vmem:[#allocation12] sm:$0xff]  ;;  %v218_v20 = vld [vmem:[#allocation10 + $0x38] sm:$0xff] }
  0x5f   :  { %597 = vmatprep.subr.msk.bf16.mxu1 %vm912_vm1, %v595_v6  ;;  %528 = vmatprep.mubr.msk.f32.mxu0 %vm98_vm0, %v103_v9  ;;  %v583_v15 = vpack.c.bf16 %v110_v14, %v109_v12  ;;  %v362_v18 = vld [vmem:[#allocation12 + $0x8] sm:$0xff]  ;;  %v217_v19 = vld [vmem:[#allocation10 + $0x30] sm:$0xff]  ;;  %v364_v24 = vld [vmem:[#allocation12 + $0x18] sm:$0xff]  ;;  %p770_p1 = por %p769_p0, %p768_p13 }
  0x60   :  { %579 = vmatprep.subr.msk.bf16.mxu0 %vm912_vm1, %v577_v13  ;;  %v637_v21 = vpack.c.bf16 %v362_v18, %v361_v17  ;;  %v607_v22 = vpack.c.bf16 %v218_v20, %v217_v19  ;;  %v363_v23 = vld [vmem:[#allocation12 + $0x10] sm:$0xff]  ;;  %v219_v25 = vld [vmem:[#allocation10 + $0x40] sm:$0xff]  ;;  %v220_v26 = vld [vmem:[#allocation10 + $0x48] sm:$0xff] }
  0x61   :  { %582 = vmatpush3.bf16.xpose.msk.msra.mxu0 %vm912_vm1, %v577_v13  ;;  %v641_v27 = vpack.c.bf16 %v364_v24, %v363_v23  ;;  %v104_v28 = vld [vmem:[#allocation4 + $0x8] sm:$0xff]  ;;  %v613_v29 = vpack.c.bf16 %v220_v26, %v219_v25  ;;  %v223_v33 = vld [vmem:[#allocation10 + $0x60] sm:$0xff]  ;;  %v224_v34 = vld [vmem:[#allocation10 + $0x68] sm:$0xff]  ;;  %p771_p2 = pnand %p770_p1, %p764_p12 }
  0x62   :  { %585 = vmatprep.subr.msk.bf16.mxu0 %vm912_vm1, %v583_v15  ;;  %v221_v30 = vld [vmem:[#allocation10 + $0x50] sm:$0xff]  ;;  %v222_v31 = vld [vmem:[#allocation10 + $0x58] sm:$0xff]  ;;  %v625_v35 = vpack.c.bf16 %v224_v34, %v223_v33 }
  0x63   :  { %v619_v32 = vpack.c.bf16 %v222_v31, %v221_v30  ;;  %v225_v36 = vld [vmem:[#allocation10 + $0x70] sm:$0xff]  ;;  %v226_v37 = vld [vmem:[#allocation10 + $0x78] sm:$0xff] }
  0x64   :  { %v631_v38 = vpack.c.bf16 %v226_v37, %v225_v36  ;;  %v465_v39 = vld [vmem:[#allocation9] ss:$0 sm:$0xff] }
  0x65   :  { %100 = vst.msk [vmem:[#allocation2 + $0x8] sm:$0xff] %vm98_vm0, %v465_v39  ;;  %99 = vst.msk [vmem:[#allocation2] sm:$0xff] %vm98_vm0, %v465_v39 }
  0x66   :  { %600 = vmatpush3.bf16.xpose.msk.msra.mxu1 %vm912_vm1, %v595_v6 }
  0x67   :  { %603 = vmatprep.subr.msk.bf16.mxu1 %vm912_vm1, %v601_v16 }
  0x69   :  { %588 = vmatpush3.bf16.xpose.msk.msra.mxu0 %vm912_vm1, %v583_v15 }
  0x6a   :  { %638 = vmatprep.subr.bf16.mxu0 %v637_v21 }
  0x6c   :  { %v106_v40 = vld [vmem:[#allocation2 + $0x8] sm:$0xff]  ;;  %v105_v41 = vld [vmem:[#allocation2] sm:$0xff] }
  0x6e   :  { %606 = vmatpush3.bf16.xpose.msk.msra.mxu1 %vm912_vm1, %v601_v16 }
  0x6f   :  { %609 = vmatprep.subr.msk.bf16.mxu1 %vm912_vm1, %v607_v22 }
  0x70   :  { %529 = vmatmul.mubr.msk.f32.vlgmr.msra.gmra.mrb[0].mxu0 %vm98_vm0, %v104_v28 }
  0x71   :  { %640 = vmatpush3.bf16.xpose.msra.mxu0 %v637_v21 }
  0x72   :  { %642 = vmatprep.subr.bf16.mxu0 %v641_v27 }
  0x76   :  { %612 = vmatpush3.bf16.xpose.msk.msra.mxu1 %vm912_vm1, %v607_v22 }
  0x77   :  { %615 = vmatprep.subr.msk.bf16.mxu1 %vm912_vm1, %v613_v29 }
  0x79   :  { %644 = vmatpush3.bf16.xpose.msra.mxu0 %v641_v27 }
  0x7e   :  { %618 = vmatpush3.bf16.xpose.msk.msra.mxu1 %vm912_vm1, %v613_v29 }
  0x7f   :  { %621 = vmatprep.subr.msk.bf16.mxu1 %vm912_vm1, %v619_v32 }
  0x86   :  { %624 = vmatpush3.bf16.xpose.msk.msra.mxu1 %vm912_vm1, %v619_v32 }
  0x87   :  { %627 = vmatprep.subr.msk.bf16.mxu1 %vm912_vm1, %v625_v35 }
  0x8e   :  { %630 = vmatpush3.bf16.xpose.msk.msra.mxu1 %vm912_vm1, %v625_v35 }
  0x8f   :  { %633 = vmatprep.subr.msk.bf16.mxu1 %vm912_vm1, %v631_v38 }
  0x96   :  { %636 = vmatpush3.bf16.xpose.msk.msra.mxu1 %vm912_vm1, %v631_v38 }
  0x9d   :  { %564 = vmatmul.mubr.msk.f32.vlgmr.msra.gmra.mrb[0].mxu1 %vm98_vm0, %v104_v28 }
 0x143   :  { %v530_v42 = vpop.f32.mrb[0].mxu0 }
 0x144   :  { %v206_v43 = vadd.f32 %v530_v42, %v106_v40  ;;  %v196_v44 = vpop.f32.mrb[1].mxu0 }
 0x145   :  { %v205_v45 = vadd.f32 %v196_v44, %v105_v41 }
 0x146   :  { %208 = vst.msk [vmem:[#allocation2 + $0x8] sm:$0xff] %vm98_vm0, %v206_v43 }
 0x147   :  { %207 = vst.msk [vmem:[#allocation2] sm:$0xff] %vm98_vm0, %v205_v45 }
 0x14d   :  { %v441_v51 = vld [vmem:[#allocation2 + $0x8] sm:$0xff] }
 0x14e   :  { %v440_v54 = vld [vmem:[#allocation2] sm:$0xff] }
 0x170   :  { %v565_v46 = vpop.f32.mrb[0].mxu1 }
 0x171   :  { %v341_v47 = vpop.f32.mrb[1].mxu1  ;;  %v360_v49 = vmul.f32 2.0, %v565_v46 }
 0x172   :  { %v359_v48 = vmul.f32 2.0, %v341_v47 }
 0x174   :  { %574 = vmatprep.mubr.f32.mxu0 %v359_v48 }
 0x175   :  { %575 = vmatmul.mubr.f32.vlgmr.msra.gmra.mrb[2].mxu0 %v360_v49 }
 0x248   :  { %v576_v50 = vpop.f32.mrb[2].mxu0 }
 0x249   :  { %v443_v52 = vadd.f32 %v576_v50, %v441_v51  ;;  %v431_v53 = vpop.f32.mrb[3].mxu0 }
 0x24a   :  { %v442_v55 = vadd.f32 %v440_v54, %v431_v53 }
 0x24b   :  { %445 = vst.msk [vmem:[#allocation13 + $0x8] sm:$0xff] %vm98_vm0, %v443_v52 }
 0x24c   :  { %444 = vst.msk [vmem:[#allocation13] sm:$0xff] %vm98_vm0, %v442_v55 }
 0x24d   :  { %774 = shalt.err (!%p771_p2)
}
 0x24e   :  { %s775_s8 = scalar_lea.hbm %s986_s5, 256 }
 0x24f   :  { %p776_p3 = scmp.ne.s32.totalorder %s986_s5, %s775_s8  ;;  %p779_p4 = scmp.lt.u32.totalorder %s775_s8, %s986_s5 }
 0x251   :  { %p781_p5 = pnand %p779_p4, %p776_p3 }
 0x253   :  { %784 = shalt.err (!%p781_p5)
}
 0x254   :  { %457 = dma.vmem_to_hbm [thread:$0]  %s452_s29, 256, %s986_s5, [#allocation6], %s795_s30, %s795_s30, %s796_s6  }
 0x255   :  { %791 = dma.done.wait [#allocation6], 256  }
 0x256   :  { %792 = vsyncadd [#allocation6], 4294967040 }
 0x257   :  { %461 = vsyncpa [#allocation5], 1 }
 0x258   :  { %462 = vsyncpa [#allocation8], 1 }
 0x259   :  { %463 = vsyncpa [#allocation11], 1 }
 0x25a   :  { %464 = vsyncpa [#allocation6], 1 }

</bundles_post_ra>
